<compile_context>
chip_gen: v7x
topology: tpu7x:2x2x1
jax: 0.10.0
libtpu: 0.0.40
codegen_flags: <defaults>
</compile_context>

<pallas_src>
import functools

import jax
import jax.numpy as jnp
from jax import lax
from jax.experimental import pallas as pl
from jax.experimental.pallas import tpu as pltpu

TEMPERATURE = 0.07
_EPS = 1e-12  # torch.nn.functional.normalize default eps


def _infonce_kernel(mel_ref, chd_ref, out_ref, *scratch,
                    inv_t, batch, dot_dtype, tile, rc, cache_chords):
    if cache_chords:
        mel_n_s, chd_n_s, s_r, s_c, acc = scratch
    else:
        mel_n_s, s_r, s_c, acc = scratch

    i = pl.program_id(0)          # melody (row) tile
    j = pl.program_id(1)          # chord (column) tile, innermost
    n_i = pl.num_programs(0)
    n_j = pl.num_programs(1)
    eps2 = jnp.float32(_EPS * _EPS)
    inv_t_f = jnp.float32(inv_t)

    @pl.when(jnp.logical_and(i == 0, j == 0))
    def _init_acc():
        acc[0] = jnp.float32(0.0)

    # Normalize the melody row tile once per row sweep; fold 1/temperature
    # into the per-row scale so logits come out pre-scaled.
    @pl.when(j == 0)
    def _prep_rows():
        m = mel_ref[...].astype(jnp.float32)
        ssq = jnp.sum(m * m, axis=1, keepdims=True)
        scale = lax.rsqrt(jnp.maximum(ssq, eps2)) * inv_t_f
        mel_n_s[...] = (m * scale).astype(dot_dtype)
        s_r[...] = jnp.zeros_like(s_r)

    c0 = pl.multiple_of(j * tile, tile)

    # First row sweep: zero the column exp-sum for this column tile and
    # (optionally) normalize+cache the chord tile exactly once.
    @pl.when(i == 0)
    def _prep_cols():
        s_c[j] = jnp.zeros((1, tile), jnp.float32)
        if cache_chords:
            c = chd_ref[pl.ds(c0, tile), :].astype(jnp.float32)
            ssq = jnp.sum(c * c, axis=1, keepdims=True)
            chd_n_s[j] = (c * lax.rsqrt(jnp.maximum(ssq, eps2))).astype(dot_dtype)

    if cache_chords:
        chd_n = chd_n_s[j]                                   # (tile, D)
    else:
        # Cheap VPU re-normalization from the resident raw chord block.
        c = chd_ref[pl.ds(c0, tile), :].astype(jnp.float32)
        ssq = jnp.sum(c * c, axis=1, keepdims=True)
        chd_n = (c * lax.rsqrt(jnp.maximum(ssq, eps2))).astype(dot_dtype)

    n_rc = tile // rc
    p_sub = 8 if rc % 8 == 0 else 1

    # Chunked single pass: exp each (rc, tile) slab once; feed both the row
    # and column accumulators; never materialize the full (tile, tile) p.
    def _chunk(cidx, col_part):
        r0 = pl.multiple_of(cidx * rc, rc) if rc % 8 == 0 else cidx * rc
        m_c = mel_n_s[pl.ds(r0, rc), :]                      # (rc, D), scaled by 1/T
        logit = lax.dot_general(m_c, chd_n, (((1,), (1,)), ((), ())),
                                preferred_element_type=jnp.float32)
        p = jnp.exp(logit)                                   # bounded by exp(1/T)
        s_r[pl.ds(r0, rc), :] = (s_r[pl.ds(r0, rc), :]
                                 + jnp.sum(p, axis=1, keepdims=True))
        # Lane-dense column partial; cross-sublane reduce deferred to the end.
        return col_part + p.reshape(rc // p_sub, p_sub, tile).sum(axis=0)

    col_part = lax.fori_loop(0, n_rc, _chunk,
                             jnp.zeros((p_sub, tile), jnp.float32),
                             unroll=(n_rc <= 8))
    s_c[j] = s_c[j] + jnp.sum(col_part, axis=0, keepdims=True)

    # Positive-pair (diagonal) contribution; tiles are square so the global
    # diagonal lives exactly in tiles with i == j.
    @pl.when(i == j)
    def _diag():
        acc[0] += -2.0 * jnp.sum(mel_n_s[...].astype(jnp.float32) *
                                 chd_n.astype(jnp.float32))

    # Finalize row logsumexp for this row tile (no shift needed).
    @pl.when(j == n_j - 1)
    def _row_lse():
        acc[0] += jnp.sum(jnp.log(s_r[...]))

    # Finalize column logsumexp for this column tile.
    @pl.when(i == n_i - 1)
    def _col_lse():
        acc[0] += jnp.sum(jnp.log(s_c[j]))

    # loss = (sum lse_rows + sum lse_cols - 2 * sum diag) / (2 * B)
    @pl.when(jnp.logical_and(i == n_i - 1, j == n_j - 1))
    def _emit():
        out_ref[0, 0] = acc[0] / jnp.float32(2.0 * batch)


def _pick_tile(b, max_tile=None):
    """Largest tile dividing b (single full tile for b <= 1024)."""
    cap = min(1024, max_tile) if max_tile else 1024
    if b <= cap:
        return b
    for t in (1024, 768, 512, 384, 256, 128, 64, 32, 16, 8):
        if t <= cap and b % t == 0:
            return t
    return b  # TODO(synk): pad ragged batch sizes instead of one full-size tile


def _pick_chunk(tile):
    """Row-chunk size: keep the live exp() slab to ~64 KiB of f32."""
    budget = 16 * 1024  # f32 elements per chunked p slab
    for rc in (256, 128, 96, 64, 48, 32, 24, 16, 8):
        if tile % rc == 0 and rc * tile <= budget:
            return rc
    return tile


def infonce_loss(melody_embeds, chord_embeds, temperature=TEMPERATURE, *,
                 max_tile=None):
    """melody_embeds, chord_embeds: [batch, embed_dim] -> scalar loss (f32)."""
    assert melody_embeds.shape == chord_embeds.shape
    assert melody_embeds.ndim == 2
    # exp(logits) is computed without any shift; cosine logits are bounded by
    # 1/T, and exp(1/T) must stay finite/well-scaled in f32 (T>=0.025 -> e^40).
    assert temperature >= 0.025, (
        "unshifted softmax-sum assumes temperature >= ~0.025 (f32 exp range)")
    b, d = melody_embeds.shape
    tile = _pick_tile(b, max_tile)
    n_t = b // tile
    rc = _pick_chunk(tile)

    # Normalize in f32, but feed the MXU bf16 if the inputs are bf16.
    dot_dtype = (jnp.bfloat16 if melody_embeds.dtype == jnp.bfloat16
                 else jnp.float32)
    in_sz = jnp.dtype(melody_embeds.dtype).itemsize
    dsz = jnp.dtype(dot_dtype).itemsize

    # Generation-aware VMEM budgeting (v7x: 64 MiB, v5e/v6e: 128 MiB).
    vmem_cap = 64 * 1024 * 1024
    try:
        vmem_cap = int(pltpu.get_tpu_info().vmem_capacity_bytes) or vmem_cap
    except Exception:
        pass

    base_vmem = (2 * tile * d * in_sz        # melody block (double-buffered)
                 + 2 * b * d * in_sz         # resident full chord block
                 + tile * d * dsz            # normalized melody cache
                 + 4 * (tile + n_t * tile)   # row / column exp-sums
                 + 8 * rc * tile)            # chunked exp working-set headroom
    cache_bytes = b * d * dsz                # normalized chord cache
    cache_chords = (base_vmem + cache_bytes) <= int(0.6 * vmem_cap)
    est_vmem = base_vmem + (cache_bytes if cache_chords else 0)
    vmem_limit = int(min(0.85 * vmem_cap, max(2 * est_vmem, 32 * 1024 * 1024)))

    kernel = functools.partial(
        _infonce_kernel, inv_t=1.0 / float(temperature), batch=b,
        dot_dtype=dot_dtype, tile=tile, rc=rc, cache_chords=cache_chords)

    scratch = [pltpu.VMEM((tile, d), dot_dtype)]            # normalized melody
    if cache_chords:
        scratch.append(pltpu.VMEM((n_t, tile, d), dot_dtype))  # normalized chords
    scratch += [
        pltpu.VMEM((tile, 1), jnp.float32),                 # row exp-sums
        pltpu.VMEM((n_t, 1, tile), jnp.float32),            # column exp-sums
        pltpu.SMEM((1,), jnp.float32),                      # scalar loss acc
    ]

    cost = pl.CostEstimate(flops=2 * b * b * d + 6 * b * d,
                           transcendentals=b * b + 2 * b,
                           bytes_accessed=2 * b * d * in_sz + 4)

    out = pl.pallas_call(
        kernel,
        out_shape=jax.ShapeDtypeStruct((1, 1), jnp.float32),
        grid_spec=pltpu.PrefetchScalarGridSpec(
            num_scalar_prefetch=0,
            grid=(n_t, n_t),
            in_specs=[
                # Melody row tile: re-fetched only when the row tile changes.
                pl.BlockSpec((tile, d), lambda i, j: (i, 0)),
                # Chords: full-array resident block -> one HBM->VMEM DMA for
                # the entire kernel (block index never changes).
                pl.BlockSpec((b, d), lambda i, j: (0, 0)),
            ],
            out_specs=pl.BlockSpec((1, 1), lambda i, j: (0, 0),
                                   memory_space=pltpu.MemorySpace.SMEM),
            scratch_shapes=scratch),
        compiler_params=pltpu.CompilerParams(
            dimension_semantics=("arbitrary", "arbitrary"),
            vmem_limit_bytes=vmem_limit),
        cost_estimate=cost,
    )(melody_embeds, chord_embeds)
    return out[0, 0]


def _reference(melody_embeds, chord_embeds, temperature=TEMPERATURE):
    m = melody_embeds / jnp.maximum(
        jnp.linalg.norm(melody_embeds, axis=1, keepdims=True), _EPS)
    c = chord_embeds / jnp.maximum(
        jnp.linalg.norm(chord_embeds, axis=1, keepdims=True), _EPS)
    logits = (m @ c.T) / temperature
    lab = jnp.arange(logits.shape[0])
    lse_r = jax.scipy.special.logsumexp(logits, axis=1)
    lse_c = jax.scipy.special.logsumexp(logits, axis=0)
    diag = logits[lab, lab]
    return (jnp.mean(lse_r - diag) + jnp.mean(lse_c - diag)) / 2.0


if __name__ == "__main__":
    key = jax.random.PRNGKey(0)
    k1, k2, k3, k4 = jax.random.split(key, 4)

    # Small case (single tile, single chunk), shapes consistent with training.
    mel_s = jax.random.normal(k1, (8, 32), dtype=jnp.float32)
    chd_s = jax.random.normal(k2, (8, 32), dtype=jnp.float32)
    loss_s = jax.block_until_ready(infonce_loss(mel_s, chd_s))
    ref_s = jax.block_until_ready(_reference(mel_s, chd_s))
    assert jnp.isfinite(loss_s), "small-case loss is not finite"
    assert abs(float(loss_s) - float(ref_s)) < 2e-3, (float(loss_s), float(ref_s))

    # Medium case, default tiling: single 384-tile fast path + chunked exp loop.
    mel_m = jax.random.normal(k3, (384, 64), dtype=jnp.float32)
    chd_m = jax.random.normal(k4, (384, 64), dtype=jnp.float32)
    loss_m = jax.block_until_ready(infonce_loss(mel_m, chd_m))
    ref_m = jax.block_until_ready(_reference(mel_m, chd_m))
    assert jnp.isfinite(loss_m), "single-tile loss is not finite"
    assert abs(float(loss_m) - float(ref_m)) < 2e-3, (float(loss_m), float(ref_m))

    # Forced multi-tile case: exercises the 3x3 grid, the resident chord block,
    # the normalized-tile caches and the cross-tile row/column accumulators.
    loss_t = jax.block_until_ready(infonce_loss(mel_m, chd_m, max_tile=128))
    assert jnp.isfinite(loss_t), "multi-tile loss is not finite"
    assert abs(float(loss_t) - float(ref_m)) < 2e-3, (float(loss_t), float(ref_m))

    print("KERNEL_OK")
</pallas_src>

<mosaic_0001>
module attributes {stable_mosaic.version = 11 : i64} {
  func.func @_infonce_kernel(%arg0: i32, %arg1: i32, %arg2: memref<8x32xf32, #tpu.memory_space<vmem>>, %arg3: memref<8x32xf32, #tpu.memory_space<vmem>>, %arg4: memref<1x1xf32, #tpu.memory_space<smem>>, %arg5: memref<8x32xf32, #tpu.memory_space<vmem>>, %arg6: memref<1x8x32xf32, #tpu.memory_space<vmem>>, %arg7: memref<8x1xf32, #tpu.memory_space<vmem>>, %arg8: memref<1x1x8xf32, #tpu.memory_space<vmem>>, %arg9: memref<1xf32, #tpu.memory_space<smem>>) attributes {dimension_semantics = [#tpu.dimension_semantics<arbitrary>, #tpu.dimension_semantics<arbitrary>], iteration_bounds = array<i64: 1, 1>, scalar_prefetch = 0 : i64, scratch_operands = 5 : i64, tpu.core_type = #tpu.core_type<tc>, window_params = [{transform_indices = @transform_0, window_bounds = array<i64: 8, 32>}, {pipeline_mode = #tpu.pipeline_mode<synchronous>, transform_indices = @transform_1, window_bounds = array<i64: 8, 32>}, {transform_indices = @transform_2, window_bounds = array<i64: 1, 1>}]} {
    %c0_i32 = arith.constant 0 : i32
    %0 = arith.cmpi eq, %arg0, %c0_i32 : i32
    %c0_i32_0 = arith.constant 0 : i32
    %1 = arith.cmpi eq, %arg1, %c0_i32_0 : i32
    %2 = arith.andi %0, %1 : i1
    %3 = arith.extui %2 : i1 to i32
    %c0_i32_1 = arith.constant 0 : i32
    %4 = arith.cmpi ne, %3, %c0_i32_1 : i32
    scf.if %4 {
      %cst_31 = arith.constant 0.000000e+00 : f32
      %c0_32 = arith.constant 0 : index
      %57 = memref.load %arg9[%c0_32] : memref<1xf32, #tpu.memory_space<smem>>
      memref.store %cst_31, %arg9[%c0_32] : memref<1xf32, #tpu.memory_space<smem>>
    } else {
    }
    %c0_i32_2 = arith.constant 0 : i32
    %5 = arith.cmpi eq, %arg1, %c0_i32_2 : i32
    %6 = arith.extui %5 : i1 to i32
    %cst = arith.constant 1.000000e-24 : f32
    %cst_3 = arith.constant 14.2857141 : f32
    %c0_i32_4 = arith.constant 0 : i32
    %7 = arith.cmpi ne, %6, %c0_i32_4 : i32
    scf.if %7 {
      %c0_31 = arith.constant 0 : index
      %c0_32 = arith.constant 0 : index
      %57 = vector.load %arg2[%c0_31, %c0_32] : memref<8x32xf32, #tpu.memory_space<vmem>>, vector<8x32xf32>
      %58 = arith.mulf %57, %57 : vector<8x32xf32>
      %cst_33 = arith.constant dense<0.000000e+00> : vector<8xf32>
      %59 = vector.multi_reduction <add>, %58, %cst_33 [1] : vector<8x32xf32> to vector<8xf32>
      %60 = vector.shape_cast %59 : vector<8xf32> to vector<8x1xf32>
      %61 = vector.broadcast %cst : f32 to vector<8x1xf32>
      %62 = arith.maximumf %60, %61 : vector<8x1xf32>
      %63 = math.rsqrt %62 : vector<8x1xf32>
      %64 = vector.broadcast %cst_3 : f32 to vector<8x1xf32>
      %65 = arith.mulf %63, %64 : vector<8x1xf32>
      %66 = vector.broadcast %65 : vector<8x1xf32> to vector<8x32xf32>
      %67 = arith.mulf %57, %66 : vector<8x32xf32>
      %c0_34 = arith.constant 0 : index
      %c0_35 = arith.constant 0 : index
      %68 = vector.load %arg5[%c0_34, %c0_35] : memref<8x32xf32, #tpu.memory_space<vmem>>, vector<8x32xf32>
      tpu.vector_store %arg5[%c0_34, %c0_35], %67 {strides = array<i32>} : memref<8x32xf32, #tpu.memory_space<vmem>>, vector<8x32xf32>,
      %cst_36 = arith.constant 0.000000e+00 : f32
      %69 = vector.broadcast %cst_36 : f32 to vector<8x1xf32>
      %c0_37 = arith.constant 0 : index
      %c0_38 = arith.constant 0 : index
      %70 = vector.load %arg7[%c0_37, %c0_38] : memref<8x1xf32, #tpu.memory_space<vmem>>, vector<8x1xf32>
      tpu.vector_store %arg7[%c0_37, %c0_38], %69 {strides = array<i32>} : memref<8x1xf32, #tpu.memory_space<vmem>>, vector<8x1xf32>,
    } else {
    }
    %c8_i32 = arith.constant 8 : i32
    %8 = arith.muli %arg1, %c8_i32 : i32
    %9 = tpu.assume_multiple %8, 8 : i32
    %c0_i32_5 = arith.constant 0 : i32
    %10 = arith.cmpi eq, %arg0, %c0_i32_5 : i32
    %11 = arith.extui %10 : i1 to i32
    %cst_6 = arith.constant 1.000000e-24 : f32
    %c0_i32_7 = arith.constant 0 : i32
    %12 = arith.cmpi ne, %11, %c0_i32_7 : i32
    scf.if %12 {
      %cst_31 = arith.constant 0.000000e+00 : f32
      %57 = vector.broadcast %cst_31 : f32 to vector<1x8xf32>
      %58 = arith.index_cast %arg1 : i32 to index
      %c0_32 = arith.constant 0 : index
      %c0_33 = arith.constant 0 : index
      %59 = vector.load %arg8[%58, %c0_32, %c0_33] : memref<1x1x8xf32, #tpu.memory_space<vmem>>, vector<1x1x8xf32>
      %60 = vector.shape_cast %59 : vector<1x1x8xf32> to vector<1x8xf32>
      %61 = vector.shape_cast %57 : vector<1x8xf32> to vector<1x1x8xf32>
      tpu.vector_store %arg8[%58, %c0_32, %c0_33], %61 {strides = array<i32>} : memref<1x1x8xf32, #tpu.memory_space<vmem>>, vector<1x1x8xf32>,
      %62 = arith.index_cast %9 : i32 to index
      %c0_34 = arith.constant 0 : index
      %63 = vector.load %arg3[%62, %c0_34] : memref<8x32xf32, #tpu.memory_space<vmem>>, vector<8x32xf32>
      %64 = arith.mulf %63, %63 : vector<8x32xf32>
      %cst_35 = arith.constant dense<0.000000e+00> : vector<8xf32>
      %65 = vector.multi_reduction <add>, %64, %cst_35 [1] : vector<8x32xf32> to vector<8xf32>
      %66 = vector.shape_cast %65 : vector<8xf32> to vector<8x1xf32>
      %67 = vector.broadcast %cst_6 : f32 to vector<8x1xf32>
      %68 = arith.maximumf %66, %67 : vector<8x1xf32>
      %69 = math.rsqrt %68 : vector<8x1xf32>
      %70 = vector.broadcast %69 : vector<8x1xf32> to vector<8x32xf32>
      %71 = arith.mulf %63, %70 : vector<8x32xf32>
      %72 = arith.index_cast %arg1 : i32 to index
      %c0_36 = arith.constant 0 : index
      %c0_37 = arith.constant 0 : index
      %73 = vector.load %arg6[%72, %c0_36, %c0_37] : memref<1x8x32xf32, #tpu.memory_space<vmem>>, vector<1x8x32xf32>
      %74 = vector.shape_cast %73 : vector<1x8x32xf32> to vector<8x32xf32>
      %75 = vector.shape_cast %71 : vector<8x32xf32> to vector<1x8x32xf32>
      tpu.vector_store %arg6[%72, %c0_36, %c0_37], %75 {strides = array<i32>} : memref<1x8x32xf32, #tpu.memory_space<vmem>>, vector<1x8x32xf32>,
    } else {
    }
    %13 = arith.index_cast %arg1 : i32 to index
    %c0 = arith.constant 0 : index
    %c0_8 = arith.constant 0 : index
    %14 = vector.load %arg6[%13, %c0, %c0_8] : memref<1x8x32xf32, #tpu.memory_space<vmem>>, vector<1x8x32xf32>
    %15 = vector.shape_cast %14 : vector<1x8x32xf32> to vector<8x32xf32>
    %cst_9 = arith.constant 0.000000e+00 : f32
    %16 = vector.broadcast %cst_9 : f32 to vector<8x8xf32>
    %c0_i32_10 = arith.constant 0 : i32
    %c8_i32_11 = arith.constant 8 : i32
    %17 = arith.muli %c0_i32_10, %c8_i32_11 : i32
    %18 = tpu.assume_multiple %17, 8 : i32
    %19 = arith.index_cast %18 : i32 to index
    %c0_12 = arith.constant 0 : index
    %20 = vector.load %arg5[%19, %c0_12] : memref<8x32xf32, #tpu.memory_space<vmem>>, vector<8x32xf32>
    %cst_13 = arith.constant dense<0.000000e+00> : vector<8x8xf32>
    %21 = tpu.matmul %20, %15, %cst_13 {dimension_numbers = #tpu.dot_dimension_numbers<[1], [1], [0], [0], [0, 0, 1, 0], [], []>} : vector<8x32xf32>, vector<8x32xf32>, vector<8x8xf32> -> vector<8x8xf32>
    %22 = math.exp %21 : vector<8x8xf32>
    %23 = arith.index_cast %18 : i32 to index
    %c0_14 = arith.constant 0 : index
    %24 = vector.load %arg7[%23, %c0_14] : memref<8x1xf32, #tpu.memory_space<vmem>>, vector<8x1xf32>
    %cst_15 = arith.constant dense<0.000000e+00> : vector<8xf32>
    %25 = vector.multi_reduction <add>, %22, %cst_15 [1] : vector<8x8xf32> to vector<8xf32>
    %26 = vector.shape_cast %25 : vector<8xf32> to vector<8x1xf32>
    %27 = arith.addf %24, %26 : vector<8x1xf32>
    %28 = arith.index_cast %18 : i32 to index
    %c0_16 = arith.constant 0 : index
    %29 = vector.load %arg7[%28, %c0_16] : memref<8x1xf32, #tpu.memory_space<vmem>>, vector<8x1xf32>
    tpu.vector_store %arg7[%28, %c0_16], %27 {strides = array<i32>} : memref<8x1xf32, #tpu.memory_space<vmem>>, vector<8x1xf32>,
    %30 = vector.shape_cast %22 : vector<8x8xf32> to vector<1x8x8xf32>
    %cst_17 = arith.constant dense<0.000000e+00> : vector<8x8xf32>
    %31 = vector.multi_reduction <add>, %30, %cst_17 [0] : vector<1x8x8xf32> to vector<8x8xf32>
    %32 = arith.addf %16, %31 : vector<8x8xf32>
    %c1_i32 = arith.constant 1 : i32
    %33 = arith.index_cast %arg1 : i32 to index
    %c0_18 = arith.constant 0 : index
    %c0_19 = arith.constant 0 : index
    %34 = vector.load %arg8[%33, %c0_18, %c0_19] : memref<1x1x8xf32, #tpu.memory_space<vmem>>, vector<1x1x8xf32>
    %35 = vector.shape_cast %34 : vector<1x1x8xf32> to vector<1x8xf32>
    %cst_20 = arith.constant dense<0.000000e+00> : vector<8xf32>
    %36 = vector.multi_reduction <add>, %32, %cst_20 [0] : vector<8x8xf32> to vector<8xf32>
    %37 = vector.shape_cast %36 : vector<8xf32> to vector<1x8xf32>
    %38 = arith.addf %35, %37 : vector<1x8xf32>
    %39 = arith.index_cast %arg1 : i32 to index
    %c0_21 = arith.constant 0 : index
    %c0_22 = arith.constant 0 : index
    %40 = vector.load %arg8[%39, %c0_21, %c0_22] : memref<1x1x8xf32, #tpu.memory_space<vmem>>, vector<1x1x8xf32>
    %41 = vector.shape_cast %40 : vector<1x1x8xf32> to vector<1x8xf32>
    %42 = vector.shape_cast %38 : vector<1x8xf32> to vector<1x1x8xf32>
    tpu.vector_store %arg8[%39, %c0_21, %c0_22], %42 {strides = array<i32>} : memref<1x1x8xf32, #tpu.memory_space<vmem>>, vector<1x1x8xf32>,
    %43 = arith.cmpi eq, %arg0, %arg1 : i32
    %44 = arith.extui %43 : i1 to i32
    %c0_i32_23 = arith.constant 0 : i32
    %45 = arith.cmpi ne, %44, %c0_i32_23 : i32
    scf.if %45 {
      %c0_31 = arith.constant 0 : index
      %57 = memref.load %arg9[%c0_31] : memref<1xf32, #tpu.memory_space<smem>>
      %c0_32 = arith.constant 0 : index
      %c0_33 = arith.constant 0 : index
      %58 = vector.load %arg5[%c0_32, %c0_33] : memref<8x32xf32, #tpu.memory_space<vmem>>, vector<8x32xf32>
      %59 = arith.mulf %58, %15 : vector<8x32xf32>
      %60 = vector.shape_cast %59 : vector<8x32xf32> to vector<1x8x32xf32>
      %cst_34 = arith.constant dense<0.000000e+00> : vector<1xf32>
      %61 = vector.multi_reduction <add>, %60, %cst_34 [1, 2] : vector<1x8x32xf32> to vector<1xf32>
      %62 = vector.shape_cast %61 : vector<1xf32> to vector<1x1x1xf32>
      %63 = vector.extract %62[0, 0, 0] : f32 from vector<1x1x1xf32>
      %cst_35 = arith.constant -2.000000e+00 : f32
      %64 = arith.mulf %cst_35, %63 : f32
      %65 = arith.addf %57, %64 : f32
      %c0_36 = arith.constant 0 : index
      %66 = memref.load %arg9[%c0_36] : memref<1xf32, #tpu.memory_space<smem>>
      memref.store %65, %arg9[%c0_36] : memref<1xf32, #tpu.memory_space<smem>>
    } else {
    }
    %c0_i32_24 = arith.constant 0 : i32
    %46 = arith.cmpi eq, %arg1, %c0_i32_24 : i32
    %47 = arith.extui %46 : i1 to i32
    %c0_i32_25 = arith.constant 0 : i32
    %48 = arith.cmpi ne, %47, %c0_i32_25 : i32
    scf.if %48 {
      %c0_31 = arith.constant 0 : index
      %57 = memref.load %arg9[%c0_31] : memref<1xf32, #tpu.memory_space<smem>>
      %c0_32 = arith.constant 0 : index
      %c0_33 = arith.constant 0 : index
      %58 = vector.load %arg7[%c0_32, %c0_33] : memref<8x1xf32, #tpu.memory_space<vmem>>, vector<8x1xf32>
      %59 = math.log %58 : vector<8x1xf32>
      %60 = vector.shape_cast %59 : vector<8x1xf32> to vector<1x8x1xf32>
      %cst_34 = arith.constant dense<0.000000e+00> : vector<1xf32>
      %61 = vector.multi_reduction <add>, %60, %cst_34 [1, 2] : vector<1x8x1xf32> to vector<1xf32>
      %62 = vector.shape_cast %61 : vector<1xf32> to vector<1x1x1xf32>
      %63 = vector.extract %62[0, 0, 0] : f32 from vector<1x1x1xf32>
      %64 = arith.addf %57, %63 : f32
      %c0_35 = arith.constant 0 : index
      %65 = memref.load %arg9[%c0_35] : memref<1xf32, #tpu.memory_space<smem>>
      memref.store %64, %arg9[%c0_35] : memref<1xf32, #tpu.memory_space<smem>>
    } else {
    }
    %c0_i32_26 = arith.constant 0 : i32
    %49 = arith.cmpi eq, %arg0, %c0_i32_26 : i32
    %50 = arith.extui %49 : i1 to i32
    %c0_i32_27 = arith.constant 0 : i32
    %51 = arith.cmpi ne, %50, %c0_i32_27 : i32
    scf.if %51 {
      %c0_31 = arith.constant 0 : index
      %57 = memref.load %arg9[%c0_31] : memref<1xf32, #tpu.memory_space<smem>>
      %58 = arith.index_cast %arg1 : i32 to index
      %c0_32 = arith.constant 0 : index
      %c0_33 = arith.constant 0 : index
      %59 = vector.load %arg8[%58, %c0_32, %c0_33] : memref<1x1x8xf32, #tpu.memory_space<vmem>>, vector<1x1x8xf32>
      %60 = vector.shape_cast %59 : vector<1x1x8xf32> to vector<1x8xf32>
      %61 = math.log %60 : vector<1x8xf32>
      %62 = vector.shape_cast %61 : vector<1x8xf32> to vector<1x1x8xf32>
      %cst_34 = arith.constant dense<0.000000e+00> : vector<1xf32>
      %63 = vector.multi_reduction <add>, %62, %cst_34 [1, 2] : vector<1x1x8xf32> to vector<1xf32>
      %64 = vector.shape_cast %63 : vector<1xf32> to vector<1x1x1xf32>
      %65 = vector.extract %64[0, 0, 0] : f32 from vector<1x1x1xf32>
      %66 = arith.addf %57, %65 : f32
      %c0_35 = arith.constant 0 : index
      %67 = memref.load %arg9[%c0_35] : memref<1xf32, #tpu.memory_space<smem>>
      memref.store %66, %arg9[%c0_35] : memref<1xf32, #tpu.memory_space<smem>>
    } else {
    }
    %c0_i32_28 = arith.constant 0 : i32
    %52 = arith.cmpi eq, %arg0, %c0_i32_28 : i32
    %c0_i32_29 = arith.constant 0 : i32
    %53 = arith.cmpi eq, %arg1, %c0_i32_29 : i32
    %54 = arith.andi %52, %53 : i1
    %55 = arith.extui %54 : i1 to i32
    %c0_i32_30 = arith.constant 0 : i32
    %56 = arith.cmpi ne, %55, %c0_i32_30 : i32
    scf.if %56 {
      %c0_31 = arith.constant 0 : index
      %57 = memref.load %arg9[%c0_31] : memref<1xf32, #tpu.memory_space<smem>>
      %cst_32 = arith.constant 1.600000e+01 : f32
      %58 = arith.divf %57, %cst_32 : f32
      %c0_33 = arith.constant 0 : index
      %c0_34 = arith.constant 0 : index
      %59 = memref.load %arg4[%c0_33, %c0_34] : memref<1x1xf32, #tpu.memory_space<smem>>
      memref.store %58, %arg4[%c0_33, %c0_34] : memref<1x1xf32, #tpu.memory_space<smem>>
    } else {
    }
    return
  }
  func.func @transform_0(%arg0: i32, %arg1: i32) -> (i32, i32) {
    %c0_i32 = arith.constant 0 : i32
    %c0_i32_0 = arith.constant 0 : i32
    return %arg0, %c0_i32 : i32, i32
  }
  func.func @transform_1(%arg0: i32, %arg1: i32) -> (i32, i32) {
    %c0_i32 = arith.constant 0 : i32
    %c0_i32_0 = arith.constant 0 : i32
    %c0_i32_1 = arith.constant 0 : i32
    return %c0_i32, %c0_i32_0 : i32, i32
  }
  func.func @transform_2(%arg0: i32, %arg1: i32) -> (i32, i32) {
    %c0_i32 = arith.constant 0 : i32
    %c0_i32_0 = arith.constant 0 : i32
    %c0_i32_1 = arith.constant 0 : i32
    return %c0_i32, %c0_i32_0 : i32, i32
  }
}

</mosaic_0001>

<bundles_post_ra>
// kernel: tpu_custom_call.1
= control target key start
LH: loop header
LB: loop body
LE: loop exit
PB: predicated region body
PF: predicated region fallthrough
CT: control target
= control target key end

     0   :  { %7 = vsyncpa [#allocation8], 0  ;;  %s424_s0 = inlined_call_operand.hbm [shape: f32[8,32], index: 0, kind: input, shape index: {}]   ;;  %s425_s1 = inlined_call_operand.hbm [shape: f32[8,32], index: 1, kind: input, shape index: {}]   ;;  %s426_s2 = inlined_call_operand.hbm [shape: f32[1,1], index: 2, kind: output, shape index: {}]  }
   0x1   :  { %8 = vsyncpa [#allocation11], 0 }
   0x2   :  { %9 = vsyncpa [#allocation9], 0  ;;  %s355_s9 = smov [#allocation7]   ;;  %s356_s11 = smov [#allocation10]  }
   0x3   :  { %s16_s10 = sshll.u32 %s355_s9, 4  ;;  %s26_s12 = sshll.u32 %s356_s11, 4  ;;  %s17_s10 = int_to_ptr.vmem [resolvable:$true] %s16_s10  ;;  %s27_s12 = int_to_ptr.vmem [resolvable:$true] %s26_s12 }
   0x4   :  { %s295_s15 = scalar_lea.hbm %s424_s0, 128 }
   0x5   :  { %p296_p0 = scmp.ne.s32.totalorder %s424_s0, %s295_s15  ;;  %p299_p1 = scmp.lt.u32.totalorder %s295_s15, %s424_s0 }
   0x7   :  { %p301_p2 = pnand %p299_p1, %p296_p0 }
   0x9   :  { %304 = shalt.err (!%p301_p2)
}
   0xa   :  { %s305_s20 = scalar_lea.vmem %s17_s10, 128  ;;  %p310_p4 = scmp.lt.s32.totalorder %s17_s10, %s17_s10 }
   0xb   :  { %p306_p3 = scmp.ne.s32.totalorder %s17_s10, %s305_s20  ;;  %p311_p5 = scmp.lt.s32.totalorder %s305_s20, %s305_s20 }
   0xd   :  { %p312_p6 = por %p311_p5, %p310_p4 }
   0xf   :  { %p313_p7 = pnand %p312_p6, %p306_p3 }
  0x11   :  { %316 = shalt.err (!%p313_p7)
}
  0x12   :  { %19 = dma.hbm_to_vmem [thread:$0]  %s424_s0, 128, %s17_s10, [#allocation8]  }
  0x13   :  { %s317_s25 = scalar_lea.hbm %s425_s1, 128 }
  0x14   :  { %p318_p8 = scmp.ne.s32.totalorder %s425_s1, %s317_s25  ;;  %p321_p9 = scmp.lt.u32.totalorder %s317_s25, %s425_s1 }
  0x16   :  { %p323_p10 = pnand %p321_p9, %p318_p8 }
  0x18   :  { %326 = shalt.err (!%p323_p10)
}
  0x19   :  { %s327_s30 = scalar_lea.vmem %s27_s12, 128  ;;  %p332_p12 = scmp.lt.s32.totalorder %s27_s12, %s27_s12 }
  0x1a   :  { %p328_p11 = scmp.ne.s32.totalorder %s27_s12, %s327_s30  ;;  %p333_p13 = scmp.lt.s32.totalorder %s327_s30, %s327_s30 }
  0x1c   :  { %p334_p0 = por %p333_p13, %p332_p12 }
  0x1e   :  { %p335_p1 = pnand %p334_p0, %p328_p11 }
  0x20   :  { %338 = shalt.err (!%p335_p1)
}
  0x21   :  { %29 = dma.hbm_to_vmem [thread:$0]  %s425_s1, 128, %s27_s12, [#allocation11]  }
  0x22   :  { %349 = dma.done.wait [#allocation8], 128  }
  0x23   :  { %350 = vsyncadd [#allocation8], 4294967168 }
  0x24   :  { %351 = dma.done.wait [#allocation11], 128  }
  0x25   :  { %352 = vsyncadd [#allocation11], 4294967168  ;;  %vm49_vm0 = vcmask 261120   ;;  %v67_v0 = vld [vmem:[#allocation10] sm:$0xff]  ;;  %v47_v1 = vld [vmem:[#allocation7] sm:$0xff]  ;;  %v357_v6 = vmov 0.0  }
  0x26   :  { %v68_v2 = vmul.f32 %v67_v0, %v67_v0  ;;  %v48_v3 = vmul.f32 %v47_v1, %v47_v1  ;;  %269 = vmatprep.subr.mxu0 %v357_v6  ;;  %vm358_vm1 = vmmov 0   ;;  %vm64_vm2 = vcmask 57344   ;;  %s339_s12 = scalar_lea.hbm %s426_s2, 16 }
  0x27   :  { %271 = vmatprep.mubr.msk.f32.mxu0 %vm358_vm1, %v357_v6  ;;  %65 = vst.msk [vmem:[#allocation5] sm:$0x1] %vm64_vm2, %v357_v6  ;;  %vm58_vm3 = vcmask 7168   ;;  %vm161_vm4 = vcmask 64512   ;;  %p340_p2 = scmp.ne.s32.totalorder %s426_s2, %s339_s12  ;;  %p343_p3 = scmp.lt.u32.totalorder %s339_s12, %s426_s2 }
  0x28   :  { %v70_v4 = vsel %vm49_vm0, %v68_v2, 0.0  ;;  %v50_v5 = vsel %vm49_vm0, %v48_v3, 0.0  ;;  %59 = vst.msk [vmem:[#allocation4] sm:$0xff] %vm58_vm3, %v357_v6 }
  0x29   :  { %71 = vadd.xlane.f32.xlu0 %v70_v4  ;;  %p345_p4 = pnand %p343_p3, %p340_p2 }
  0x2d   :  { %51 = vadd.xlane.f32.xlu0 %v50_v5 }
  0x2e   :  { %v170_v30 = vld [vmem:[#allocation5] sm:$0x1] }
  0x2f   :  { %v160_v37 = vld [vmem:[#allocation4] sm:$0xff] }
  0xb6   :  { %v72_v7 = vpop.xlane.xlu0 %71 }
  0xb7   :  { %v73_v8 = vmax.f32 %v72_v7, 1e-24 }
  0xb9   :  { %285 = vrsqrt.f32 %v73_v8 }
  0xba   :  { %v52_v9 = vpop.xlane.xlu0 %51 }
  0xbb   :  { %v53_v10 = vmax.f32 %v52_v9, 1e-24 }
  0xbd   :  { %287 = vrsqrt.f32 %v53_v10 }
  0xc3   :  { %v286_v11 = vpop.eup %285 }
  0xc4   :  { %v75_v12 = vmul.f32 %v286_v11, %v67_v0 }
  0xc6   :  { %77 = vst.msk [vmem:[#allocation3] sm:$0xff] %vm49_vm0, %v75_v12 }
  0xc7   :  { %v288_v13 = vpop.eup %287 }
  0xc8   :  { %v55_v14 = vmul.f32 14.285714, %v288_v13 }
  0xca   :  { %v56_v15 = vmul.f32 %v55_v14, %v47_v1 }
  0xcc   :  { %57 = vst.msk [vmem:[#allocation2] sm:$0xff] %vm49_vm0, %v56_v15 }
  0xcd   :  { %v79_v16 = vld [vmem:[#allocation3] sm:$0xff] }
  0xce   :  { %270 = vmatpush3.xpose.msk.msra.mxu0 %vm49_vm0, %v79_v16 }
  0xd3   :  { %v80_v17 = vld [vmem:[#allocation2] sm:$0xff] }
  0xd4   :  { %272 = vmatmul.mubr.msk.f32.vlgmr.msra.gmra.mrb[0].mxu0 %vm49_vm0, %v80_v17  ;;  %v187_v18 = vmul.f32 %v80_v17, %v79_v16 }
  0xd6   :  { %v188_v26 = vsel %vm49_vm0, %v187_v18, 0.0 }
 0x1a7   :  { %v154_v19 = vpop.f32.mrb[0].mxu0 }
 0x1a8   :  { %v158_v20 = vmul.f32 1.442695, %v154_v19  ;;  %v273_v21 = vpop.f32.mrb[1].mxu0 }
 0x1aa   :  { %289 = vpow2.f32 %v158_v20 }
 0x1b4   :  { %v290_v22 = vpop.eup %289 }
 0x1b5   :  { %v162_v23 = vsel %vm161_vm4, %v290_v22, 0.0 }
 0x1b6   :  { %163 = vadd.xlane.f32.xlu1 %v162_v23  ;;  %v172_v24 = vrot.slane %v162_v23, 4 }
 0x1b8   :  { %v173_v25 = vadd.f32 %v172_v24, %v162_v23 }
 0x1ba   :  { %v174_v27 = vrot.slane %v173_v25, 2  ;;  %189 = vadd.xlane.f32.xlu1 %v188_v26 }
 0x1bc   :  { %v175_v28 = vadd.f32 %v174_v27, %v173_v25 }
 0x1be   :  { %v176_v29 = vrot.slane %v175_v28, 1 }
 0x1c0   :  { %v177_v31 = vadd.f32 %v176_v29, %v175_v28 }
 0x1c2   :  { %v178_v32 = vadd.f32 %v177_v31, %v170_v30 }
 0x1c4   :  { %180 = vst.msk [vmem:[#allocation5] sm:$0x1] %vm64_vm2, %v178_v32 }
 0x1cb   :  { %v226_v33 = vld [vmem:[#allocation5] sm:$0x1] }
 0x1cc   :  { %291 = vlog2.f32 %v226_v33 }
 0x1d6   :  { %v292_v34 = vpop.eup %291 }
 0x1d7   :  { %v228_v35 = vmul.f32 0.6931472, %v292_v34 }
 0x1d9   :  { %v229_v36 = vsel %vm64_vm2, %v228_v35, 0.0 }
 0x1da   :  { %230 = vadd.xlane.f32.xlu1 %v229_v36 }
 0x243   :  { %v164_v38 = vpop.xlane.xlu1 %163 }
 0x244   :  { %v165_v39 = vadd.f32 %v164_v38, %v160_v37 }
 0x246   :  { %167 = vst.msk [vmem:[#allocation4] sm:$0xff] %vm58_vm3, %v165_v39 }
 0x247   :  { %v190_v40 = vpop.xlane.xlu1 %189 }
 0x248   :  { %v191_v41 = vrot.slane %v190_v40, 4 }
 0x24a   :  { %v192_v42 = vadd.f32 %v191_v41, %v190_v40 }
 0x24c   :  { %v193_v43 = vrot.slane %v192_v42, 2 }
 0x24d   :  { %v206_v44 = vld [vmem:[#allocation4] sm:$0xff] }
 0x24e   :  { %v194_v45 = vadd.f32 %v193_v43, %v192_v42  ;;  %293 = vlog2.f32 %v206_v44 }
 0x250   :  { %v195_v46 = vrot.slane %v194_v45, 1 }
 0x252   :  { %v196_v47 = vadd.f32 %v195_v46, %v194_v45 }
 0x254   :  { %274 = vpush %v196_v47 }
 0x258   :  { %v294_v48 = vpop.eup %293 }
 0x259   :  { %v208_v49 = vmul.f32 0.6931472, %v294_v48 }
 0x25b   :  { %v209_v50 = vsel %vm58_vm3, %v208_v49, 0.0 }
 0x25c   :  { %210 = vadd.xlane.f32.xlu0 %v209_v50 }
 0x267   :  { %v231_v51 = vpop.xlane.xlu1 %230 }
 0x268   :  { %v232_v52 = vrot.slane %v231_v51, 4 }
 0x26a   :  { %v233_v53 = vadd.f32 %v232_v52, %v231_v51 }
 0x26c   :  { %v234_v54 = vrot.slane %v233_v53, 2 }
 0x26e   :  { %v235_v58 = vadd.f32 %v234_v54, %v233_v53 }
 0x270   :  { %v236_v61 = vrot.slane %v235_v58, 1 }
 0x272   :  { %v237_v0 = vadd.f32 %v236_v61, %v235_v58 }
 0x285   :  { %s275_s1 = spop %274 }
 0x286   :  { %s198_s4 = smul.f32 -2.0, %s275_s1 }
 0x2e9   :  { %v211_v55 = vpop.xlane.xlu0 %210 }
 0x2ea   :  { %v212_v56 = vrot.slane %v211_v55, 4 }
 0x2ec   :  { %v213_v57 = vadd.f32 %v212_v56, %v211_v55 }
 0x2ee   :  { %v214_v59 = vrot.slane %v213_v57, 2 }
 0x2f0   :  { %v215_v60 = vadd.f32 %v214_v59, %v213_v57 }
 0x2f2   :  { %v216_v62 = vrot.slane %v215_v60, 1 }
 0x2f4   :  { %v217_v63 = vadd.f32 %v216_v62, %v215_v60 }
 0x2f6   :  { %276 = vpush %v217_v63 }
 0x2f7   :  { %278 = vpush %v237_v0 }
 0x327   :  { %s277_s5 = spop %276 }
 0x328   :  { %s219_s6 = sadd.f32 %s277_s5, %s198_s4  ;;  %s279_s7 = spop %278 }
 0x32a   :  { %s239_s8 = sadd.f32 %s279_s7, %s219_s6 }
 0x32c   :  { %s247_s9 = smul.f32 0.0625, %s239_s8 }
 0x32e   :  { %249 = sst [smem:[#allocation12]] %s247_s9 }
 0x32f   :  { %348 = shalt.err (!%p345_p4)
}
 0x330   :  { %s359_s17 = smov [#allocation12]  }
 0x331   :  { %257 = dma.smem_to_hbm %s359_s17, 16, %s426_s2, [#allocation9]  }
 0x332   :  { %353 = dma.done.wait [#allocation9], 16  }
 0x333   :  { %354 = vsyncadd [#allocation9], 4294967280 }
 0x334   :  { %261 = sfence }
 0x335   :  { %262 = vsyncpa [#allocation8], 1 }
 0x336   :  { %263 = vsyncpa [#allocation11], 1 }
 0x337   :  { %264 = vsyncpa [#allocation9], 1 }

</bundles_post_ra>
